<compile_context>
chip_gen: v6e
topology: v6e:2x2x1
jax: 0.10.0
libtpu: 0.0.40
codegen_flags: <defaults>
</compile_context>

<pallas_src>
import functools

import jax
import jax.numpy as jnp
from jax.experimental import pallas as pl
from jax.experimental.pallas import tpu as pltpu

_LANE = 128


def _arima001_kernel(params_ref, carry_ref, x_ref, tri_ref, strict_ref, ramp_ref, out_ref):
    """One (R, 128) tile of the series; global time = b*R*128 + row*128 + lane."""
    b = pl.program_id(0)

    ma = params_ref[0]       # SMEM scalar: maParam
    drift = params_ref[1]    # SMEM scalar: driftParam
    one_plus_ma = 1.0 + ma   # hoisted scalar

    x = x_ref[...]           # (R, 128) f32 noise tile
    rows, lanes = x.shape

    # Row-local inclusive cumsum along lanes via the MXU: local[r, t] = sum_{s <= t} x[r, s].
    local = jnp.dot(x, tri_ref[...], preferred_element_type=jnp.float32)          # (R, 128)

    # Cross-row exclusive prefix inside the tile: row totals come straight from the scan output's
    # last lane (no re-reduction); narrow (R,1) RHS keeps the matmul cost at R^2.
    row_tot = local[:, lanes - 1:lanes]                                            # (R, 1)
    row_prefix = jnp.dot(strict_ref[...], row_tot,
                         preferred_element_type=jnp.float32)                       # (R, 1)

    # Per-block carry was precomputed outside the kernel -> grid axis is fully parallel.
    prefix = row_prefix + carry_ref[b]                                             # (R, 1)
    s = local + prefix                       # global cumsum(eps) for every element of the tile

    # Fused MA(1) + integration + drift epilogue:
    #   out[t] = (1 + ma) * S[t] - ma * eps[t] + drift * t,   t = b*R*128 + ramp
    t0 = jnp.float32(rows * lanes) * b.astype(jnp.float32)                         # block time base
    out_ref[...] = one_plus_ma * s - ma * x + (drift * ramp_ref[...] + drift * t0)


@functools.partial(jax.jit, static_argnames=("rows_per_block",))
def arima001_forward(eps, ma_param, drift_param, *, rows_per_block=256):
    """eps: float32 noise, shape (1, nSamp) or (nSamp,). Returns (1, 1, nSamp) float32."""
    eps = jnp.asarray(eps, jnp.float32).reshape(-1)
    n = eps.shape[0]

    # Tile geometry: time laid out lane-dense as (rows, 128); R rows per grid step, clamped so
    # small inputs run in a single grid step.
    rows_needed = pl.cdiv(n, _LANE)
    r = min(rows_per_block, rows_needed)
    r = max(8, pl.cdiv(r, 8) * 8)                      # sublane-aligned block height
    n_blocks = pl.cdiv(rows_needed, r)
    total_rows = n_blocks * r
    n_pad = total_rows * _LANE

    # Pad with zeros (padded tail is sliced off; zeros do not perturb the cumsum).
    x = jnp.pad(eps, (0, n_pad - n)).reshape(total_rows, _LANE)

    # Pass 1 (tiny JAX glue): per-block sums -> exclusive prefix -> per-block carries.
    block_sums = jnp.sum(x.reshape(n_blocks, r * _LANE), axis=1)                   # (n_blocks,)
    carries = jnp.concatenate(
        [jnp.zeros((1,), jnp.float32), jnp.cumsum(block_sums)[:-1]])               # exclusive

    # Constant scan matrices / index ramp: tile-sized (NOT nSamp-sized), resident across the grid.
    li = jnp.arange(_LANE, dtype=jnp.int32)
    tri = (li[:, None] <= li[None, :]).astype(jnp.float32)                         # (128,128)
    ri = jnp.arange(r, dtype=jnp.int32)
    strict = (ri[None, :] < ri[:, None]).astype(jnp.float32)                       # (R,R) strict-lower
    ramp = (jnp.arange(r, dtype=jnp.float32)[:, None] * _LANE
            + jnp.arange(_LANE, dtype=jnp.float32)[None, :])                       # (R,128) local t

    params = jnp.array([ma_param, drift_param], dtype=jnp.float32)                 # SMEM scalars

    out = pl.pallas_call(
        _arima001_kernel,
        out_shape=jax.ShapeDtypeStruct((total_rows, _LANE), jnp.float32),
        grid=(n_blocks,),
        in_specs=[
            pl.BlockSpec(memory_space=pltpu.MemorySpace.SMEM),                # params
            pl.BlockSpec(memory_space=pltpu.MemorySpace.SMEM),                # per-block carries
            pl.BlockSpec((r, _LANE), lambda b: (b, 0)),                       # eps tile
            pl.BlockSpec((_LANE, _LANE), lambda b: (0, 0)),                   # tri (resident)
            pl.BlockSpec((r, r), lambda b: (0, 0)),                           # strict (resident)
            pl.BlockSpec((r, _LANE), lambda b: (0, 0)),                       # ramp (resident)
        ],
        out_specs=pl.BlockSpec((r, _LANE), lambda b: (b, 0)),
        compiler_params=pltpu.CompilerParams(
            # No cross-step carry -> blocks are independent; shard across TensorCores on v7x.
            dimension_semantics=("parallel",),
            # R=256 footprint: eps/out tiles 128 KiB x 2 bufs each + tri/strict/ramp constants
            # (~0.9 MiB double-buffered) -> ~1.5 MiB total; 16 MiB leaves ample compiler scratch.
            vmem_limit_bytes=16 * 1024 * 1024,
        ),
        cost_estimate=pl.CostEstimate(
            flops=2 * total_rows * _LANE * _LANE        # row-local scan matmul
            + 2 * n_blocks * r * r                      # cross-row prefix matmul (narrow RHS)
            + 8 * n_pad,                                # epilogue FMAs
            transcendentals=0,
            bytes_accessed=4 * (2 * n_pad + _LANE * _LANE + r * r + r * _LANE + n_blocks + 2),
        ),
    )(params, carries, x, tri, strict, ramp)

    # Restore the PyTorch (N=1, C=1, L=nSamp) output layout.
    return out.reshape(-1)[:n].reshape(1, 1, n)


if __name__ == "__main__":
    # Module "parameters" (would be __init__ args of arima001tsModule).
    ma_param = 0.6
    drift_param = 0.1
    noise_sigma = 0.5

    key = jax.random.PRNGKey(0)

    # Small single-block case (R clamps to 16) and a multi-block case (2 grid steps, padded tail)
    # that exercises the per-block carries.
    for n_samp in (2048, 33000):
        sub, key = jax.random.split(key)
        eps = noise_sigma * jax.random.normal(sub, (1, n_samp), dtype=jnp.float32)

        out = jax.block_until_ready(arima001_forward(eps, ma_param, drift_param))

        # Pure-JAX reference of the same forward math (conv -> cumsum -> drift).
        eps1d = eps[0]
        shifted = jnp.concatenate([jnp.zeros((1,), jnp.float32), eps1d[:-1]])
        ma_vec = eps1d + ma_param * shifted
        ima = jnp.cumsum(ma_vec)
        ref = (ima + drift_param * jnp.arange(n_samp, dtype=jnp.float32)).reshape(1, 1, n_samp)

        assert out.shape == (1, 1, n_samp) and out.dtype == jnp.float32
        ok = bool(jnp.allclose(out, ref, rtol=1e-4, atol=2e-2))
        max_err = float(jnp.max(jnp.abs(out - ref)))
        assert ok, f"nSamp={n_samp}: max abs error {max_err}"

    print("KERNEL_OK")
</pallas_src>

<mosaic_0001>
module attributes {stable_mosaic.version = 11 : i64} {
  func.func @_arima001_kernel(%arg0: i32, %arg1: memref<2xf32, #tpu.memory_space<smem>>, %arg2: memref<1xf32, #tpu.memory_space<smem>>, %arg3: memref<16x128xf32, #tpu.memory_space<vmem>>, %arg4: memref<128x128xf32, #tpu.memory_space<vmem>>, %arg5: memref<16x16xf32, #tpu.memory_space<vmem>>, %arg6: memref<16x128xf32, #tpu.memory_space<vmem>>, %arg7: memref<16x128xf32, #tpu.memory_space<vmem>>) attributes {dimension_semantics = [#tpu.dimension_semantics<parallel>], iteration_bounds = array<i64: 1>, scalar_prefetch = 0 : i64, scratch_operands = 0 : i64, tpu.core_type = #tpu.core_type<tc>, window_params = [{transform_indices = @transform_0, window_bounds = array<i64: 2>}, {transform_indices = @transform_1, window_bounds = array<i64: 1>}, {transform_indices = @transform_2, window_bounds = array<i64: 16, 128>}, {pipeline_mode = #tpu.pipeline_mode<synchronous>, transform_indices = @transform_3, window_bounds = array<i64: 128, 128>}, {pipeline_mode = #tpu.pipeline_mode<synchronous>, transform_indices = @transform_4, window_bounds = array<i64: 16, 16>}, {pipeline_mode = #tpu.pipeline_mode<synchronous>, transform_indices = @transform_5, window_bounds = array<i64: 16, 128>}, {transform_indices = @transform_6, window_bounds = array<i64: 16, 128>}]} {
    %c0 = arith.constant 0 : index
    %0 = memref.load %arg1[%c0] : memref<2xf32, #tpu.memory_space<smem>>
    %c1 = arith.constant 1 : index
    %1 = memref.load %arg1[%c1] : memref<2xf32, #tpu.memory_space<smem>>
    %cst = arith.constant 1.000000e+00 : f32
    %2 = arith.addf %cst, %0 : f32
    %c0_0 = arith.constant 0 : index
    %c0_1 = arith.constant 0 : index
    %3 = vector.load %arg3[%c0_0, %c0_1] : memref<16x128xf32, #tpu.memory_space<vmem>>, vector<16x128xf32>
    %c0_2 = arith.constant 0 : index
    %c0_3 = arith.constant 0 : index
    %4 = vector.load %arg4[%c0_2, %c0_3] : memref<128x128xf32, #tpu.memory_space<vmem>>, vector<128x128xf32>
    %cst_4 = arith.constant dense<0.000000e+00> : vector<16x128xf32>
    %5 = tpu.matmul %3, %4, %cst_4 {dimension_numbers = #tpu.dot_dimension_numbers<[1], [0], [0], [1], [0, 0, 1, 1], [], []>} : vector<16x128xf32>, vector<128x128xf32>, vector<16x128xf32> -> vector<16x128xf32>
    %6 = vector.extract_strided_slice %5 {offsets = [0, 127], sizes = [16, 1], strides = [1, 1]} : vector<16x128xf32> to vector<16x1xf32>
    %c0_5 = arith.constant 0 : index
    %c0_6 = arith.constant 0 : index
    %7 = vector.load %arg5[%c0_5, %c0_6] : memref<16x16xf32, #tpu.memory_space<vmem>>, vector<16x16xf32>
    %cst_7 = arith.constant dense<0.000000e+00> : vector<16x1xf32>
    %8 = tpu.matmul %7, %6, %cst_7 {dimension_numbers = #tpu.dot_dimension_numbers<[1], [0], [0], [1], [0, 0, 1, 1], [], []>} : vector<16x16xf32>, vector<16x1xf32>, vector<16x1xf32> -> vector<16x1xf32>
    %9 = arith.index_cast %arg0 : i32 to index
    %10 = memref.load %arg2[%9] : memref<1xf32, #tpu.memory_space<smem>>
    %11 = vector.broadcast %10 : f32 to vector<16x1xf32>
    %12 = arith.addf %8, %11 : vector<16x1xf32>
    %13 = vector.broadcast %12 : vector<16x1xf32> to vector<16x128xf32>
    %14 = arith.addf %5, %13 : vector<16x128xf32>
    %15 = arith.sitofp %arg0 : i32 to f32
    %cst_8 = arith.constant 2.048000e+03 : f32
    %16 = arith.mulf %cst_8, %15 : f32
    %17 = vector.broadcast %2 : f32 to vector<16x128xf32>
    %18 = arith.mulf %17, %14 : vector<16x128xf32>
    %19 = vector.broadcast %0 : f32 to vector<16x128xf32>
    %20 = arith.mulf %19, %3 : vector<16x128xf32>
    %21 = arith.subf %18, %20 : vector<16x128xf32>
    %c0_9 = arith.constant 0 : index
    %c0_10 = arith.constant 0 : index
    %22 = vector.load %arg6[%c0_9, %c0_10] : memref<16x128xf32, #tpu.memory_space<vmem>>, vector<16x128xf32>
    %23 = vector.broadcast %1 : f32 to vector<16x128xf32>
    %24 = arith.mulf %23, %22 : vector<16x128xf32>
    %25 = arith.mulf %1, %16 : f32
    %26 = vector.broadcast %25 : f32 to vector<16x128xf32>
    %27 = arith.addf %24, %26 : vector<16x128xf32>
    %28 = arith.addf %21, %27 : vector<16x128xf32>
    %c0_11 = arith.constant 0 : index
    %c0_12 = arith.constant 0 : index
    %29 = vector.load %arg7[%c0_11, %c0_12] : memref<16x128xf32, #tpu.memory_space<vmem>>, vector<16x128xf32>
    tpu.vector_store %arg7[%c0_11, %c0_12], %28 {strides = array<i32>} : memref<16x128xf32, #tpu.memory_space<vmem>>, vector<16x128xf32>,
    return
  }
  func.func @transform_0(%arg0: i32) -> i32 {
    %c0_i32 = arith.constant 0 : i32
    %c0_i32_0 = arith.constant 0 : i32
    return %c0_i32 : i32
  }
  func.func @transform_1(%arg0: i32) -> i32 {
    %c0_i32 = arith.constant 0 : i32
    %c0_i32_0 = arith.constant 0 : i32
    return %c0_i32 : i32
  }
  func.func @transform_2(%arg0: i32) -> (i32, i32) {
    %c0_i32 = arith.constant 0 : i32
    %c0_i32_0 = arith.constant 0 : i32
    return %arg0, %c0_i32 : i32, i32
  }
  func.func @transform_3(%arg0: i32) -> (i32, i32) {
    %c0_i32 = arith.constant 0 : i32
    %c0_i32_0 = arith.constant 0 : i32
    %c0_i32_1 = arith.constant 0 : i32
    return %c0_i32, %c0_i32_0 : i32, i32
  }
  func.func @transform_4(%arg0: i32) -> (i32, i32) {
    %c0_i32 = arith.constant 0 : i32
    %c0_i32_0 = arith.constant 0 : i32
    %c0_i32_1 = arith.constant 0 : i32
    return %c0_i32, %c0_i32_0 : i32, i32
  }
  func.func @transform_5(%arg0: i32) -> (i32, i32) {
    %c0_i32 = arith.constant 0 : i32
    %c0_i32_0 = arith.constant 0 : i32
    %c0_i32_1 = arith.constant 0 : i32
    return %c0_i32, %c0_i32_0 : i32, i32
  }
  func.func @transform_6(%arg0: i32) -> (i32, i32) {
    %c0_i32 = arith.constant 0 : i32
    %c0_i32_0 = arith.constant 0 : i32
    return %arg0, %c0_i32 : i32, i32
  }
}

</mosaic_0001>

<bundles_post_ra>
// kernel: arima001_forward.1
= control target key start
LH: loop header
LB: loop body
LE: loop exit
PB: predicated region body
PF: predicated region fallthrough
CT: control target
= control target key end

     0   :  { %12 = vsyncpa [#allocation5], 0  ;;  %s511_s0 = inlined_call_operand.vmem [shape: f32[2], index: 0, kind: input, shape index: {}]   ;;  %s512_s1 = inlined_call_operand.<no memory space> [shape: f32[1], index: 1, kind: input, shape index: {}]   ;;  %s513_s2 = inlined_call_operand.vmem [shape: f32[16,128], index: 2, kind: input, shape index: {}]   ;;  %s514_s3 = inlined_call_operand.vmem [shape: f32[128,128], index: 3, kind: input, shape index: {}]   ;;  %s515_s4 = inlined_call_operand.vmem [shape: f32[16,16], index: 4, kind: input, shape index: {}]   ;;  %s516_s5 = inlined_call_operand.vmem [shape: f32[16,128], index: 5, kind: input, shape index: {}]   ;;  %s517_s6 = inlined_call_operand.hbm [shape: f32[16,128], index: 6, kind: output, shape index: {}]  }
   0x1   :  { %13 = vsyncpa [#allocation4], 0  ;;  %s20_s23 = sshll.u32 %s511_s0, 4  ;;  %s21_s23 = int_to_ptr.vmem [resolvable:$true] %s20_s23 }
   0x2   :  { %s355_s24 = scalar_lea.vmem %s21_s23, 16  ;;  %p360_p1 = scmp.lt.s32.totalorder %s21_s23, %s21_s23 }
   0x3   :  { %p356_p0 = scmp.ne.s32.totalorder %s21_s23, %s355_s24  ;;  %p361_p2 = scmp.lt.s32.totalorder %s355_s24, %s355_s24 }
   0x5   :  { %p362_p3 = por %p361_p2, %p360_p1 }
   0x7   :  { %p363_p4 = pnand %p362_p3, %p356_p0 }
   0x9   :  { %366 = shalt.err (!%p363_p4)
}
   0xa   :  { %s391_s25 = smov [#allocation3]  }
   0xb   :  { %23 = dma.vmem_to_smem %s21_s23, 16, %s391_s25, [#allocation5]  }
   0xc   :  { %387 = dma.done.wait [#allocation5], 16  }
   0xd   :  { %388 = vsyncadd [#allocation5], 4294967280 }
   0xe   :  { %37 = sfence }
   0xf   :  { %v58_v0 = vld [vmem:[%s514_s3 + $0x78] sm:$0xff]  ;;  %v57_v1 = vld [vmem:[%s514_s3 + $0x70] sm:$0xff]  ;;  %v56_v2 = vld [vmem:[%s514_s3 + $0x68] sm:$0xff]  ;;  %vm146_vm0 = vcmask 130048   ;;  %s392_s14 = smov 1   ;;  %v393_v24 = vmov 0   ;;  %v137_v26 = vstv %s512_s1 }
  0x10   :  { %305 = vmatprep.subr.mxu0 %v58_v0  ;;  %v55_v3 = vld [vmem:[%s514_s3 + $0x60] sm:$0xff]  ;;  %v54_v5 = vld [vmem:[%s514_s3 + $0x58] sm:$0xff]  ;;  %v53_v6 = vld [vmem:[%s514_s3 + $0x50] sm:$0xff]  ;;  %353 = vset.pattern.permute.xlu1 %v393_v24  ;;  %s38_s17 = sld [smem:[#allocation3]]  ;;  %s394_s23 = smov [#allocation6]  }
  0x11   :  { %306 = vmatpush3.msra.mxu0 %v58_v0  ;;  %v450_v4 = vld [vmem:[%s513_s2] sm:$0xff]  ;;  %v52_v7 = vld [vmem:[%s514_s3 + $0x48] sm:$0xff]  ;;  %v50_v9 = vld [vmem:[%s514_s3 + $0x38] sm:$0xff]  ;;  %354 = vset.pattern.permute.xlu0 %v393_v24  ;;  %s280_s18 = sld [smem:[#allocation3 + $0x1]]  ;;  %s268_s24 = sshll.u32 %s394_s23, 4  ;;  %s269_s24 = int_to_ptr.vmem [resolvable:$true] %s268_s24 }
  0x12   :  { %307 = vmatprep.subr.mxu0 %v57_v1  ;;  %337 = vmatprep.mubr.f32.mxu0 %v450_v4  ;;  %v51_v8 = vld [vmem:[%s514_s3 + $0x40] sm:$0xff]  ;;  %v49_v10 = vld [vmem:[%s514_s3 + $0x30] sm:$0xff]  ;;  %v48_v11 = vld [vmem:[%s514_s3 + $0x28] sm:$0xff]  ;;  %p372_p6 = scmp.lt.s32.totalorder %s269_s24, %s269_s24 }
  0x13   :  { %308 = vmatpush3.msra.mxu0 %v57_v1  ;;  %v47_v12 = vld [vmem:[%s514_s3 + $0x20] sm:$0xff]  ;;  %v46_v13 = vld [vmem:[%s514_s3 + $0x18] sm:$0xff]  ;;  %v45_v14 = vld [vmem:[%s514_s3 + $0x10] sm:$0xff] }
  0x14   :  { %309 = vmatprep.subr.mxu0 %v56_v2  ;;  %v44_v15 = vld [vmem:[%s514_s3 + $0x8] sm:$0xff]  ;;  %v43_v16 = vld [vmem:[%s514_s3] sm:$0xff] }
  0x15   :  { %310 = vmatpush3.msra.mxu0 %v56_v2  ;;  %v42_v17 = vld [vmem:[%s513_s2 + $0x8] sm:$0xff]  ;;  %v134_v18 = vld [vmem:[%s515_s4] sm:$0xff] }
  0x16   :  { %311 = vmatprep.subr.mxu0 %v55_v3  ;;  %344 = vmatprep.mubr.msk.f32.mxu1 %vm146_vm0, %v134_v18  ;;  %v135_v23 = vld [vmem:[%s515_s4 + $0x8] sm:$0xff]  ;;  %s40_s19 = sadd.f32 1.0, %s38_s17  ;;  %v250_v30 = vld [vmem:[%s516_s5] sm:$0xff]  ;;  %v245_v32 = vstv %s38_s17 }
  0x17   :  { %312 = vmatpush3.msra.mxu0 %v55_v3  ;;  %v252_v31 = vstv %s280_s18  ;;  %s255_s21 = smul.f32 0.0, %s280_s18  ;;  %v251_v36 = vld [vmem:[%s516_s5 + $0x8] sm:$0xff]  ;;  %v246_v38 = vmul.f32 %v245_v32, %v450_v4  ;;  %v247_v44 = vmul.f32 %v245_v32, %v42_v17  ;;  %s367_s5 = scalar_lea.vmem %s269_s24, 256 }
  0x18   :  { %313 = vmatprep.subr.mxu0 %v54_v5  ;;  %v253_v33 = vmul.f32 %v252_v31, %v250_v30  ;;  %v242_v35 = vstv %s40_s19  ;;  %v254_v41 = vmul.f32 %v252_v31, %v251_v36  ;;  %p368_p5 = scmp.ne.s32.totalorder %s269_s24, %s367_s5  ;;  %p373_p7 = scmp.lt.s32.totalorder %s367_s5, %s367_s5 }
  0x19   :  { %314 = vmatpush3.msra.mxu0 %v54_v5  ;;  %v256_v37 = vstv %s255_s21 }
  0x1a   :  { %315 = vmatprep.subr.mxu0 %v53_v6  ;;  %v257_v42 = vadd.f32 %v256_v37, %v253_v33  ;;  %v258_v48 = vadd.f32 %v256_v37, %v254_v41  ;;  %p374_p8 = por %p373_p7, %p372_p6 }
  0x1b   :  { %316 = vmatpush3.msra.mxu0 %v53_v6 }
  0x1c   :  { %317 = vmatprep.subr.mxu0 %v52_v7  ;;  %p375_p9 = pnand %p374_p8, %p368_p5 }
  0x1d   :  { %318 = vmatpush3.msra.mxu0 %v52_v7 }
  0x1e   :  { %319 = vmatprep.subr.mxu0 %v51_v8 }
  0x1f   :  { %320 = vmatpush3.msra.mxu0 %v51_v8 }
  0x20   :  { %321 = vmatprep.subr.mxu0 %v50_v9 }
  0x21   :  { %322 = vmatpush3.msra.mxu0 %v50_v9 }
  0x22   :  { %323 = vmatprep.subr.mxu0 %v49_v10 }
  0x23   :  { %324 = vmatpush3.msra.mxu0 %v49_v10 }
  0x24   :  { %325 = vmatprep.subr.mxu0 %v48_v11 }
  0x25   :  { %326 = vmatpush3.msra.mxu0 %v48_v11 }
  0x26   :  { %327 = vmatprep.subr.mxu0 %v47_v12 }
  0x27   :  { %328 = vmatpush3.msra.mxu0 %v47_v12 }
  0x28   :  { %329 = vmatprep.subr.mxu0 %v46_v13 }
  0x29   :  { %330 = vmatpush3.msra.mxu0 %v46_v13 }
  0x2a   :  { %331 = vmatprep.subr.mxu0 %v45_v14 }
  0x2b   :  { %332 = vmatpush3.msra.mxu0 %v45_v14 }
  0x2c   :  { %333 = vmatprep.subr.mxu0 %v44_v15 }
  0x2d   :  { %334 = vmatpush3.msra.mxu0 %v44_v15 }
  0x2e   :  { %335 = vmatprep.subr.mxu0 %v43_v16 }
  0x2f   :  { %336 = vmatpush3.msra.mxu0 %v43_v16 }
  0x30   :  { %338 = vmatmul.mubr.f32.vlgmr.msra.gmra.mxu0 %v42_v17 }
  0xf0   :  { %v339_v19 = vpop.f32.mrf.mxu0 }
  0xf1   :  { %142 = vrot.lane.b32.xlu0 %v339_v19, %s392_s14 }
  0xf2   :  { %v125_v20 = vpop.f32.mrf.mxu0 }
  0xf5   :  { %140 = vrot.lane.b32.xlu0 %v125_v20, %s392_s14 }
 0x163   :  { %v143_v21 = vpop.permute.xlu0 %142 }
 0x164   :  { %340 = vmatprep.subr.mxu1 %v143_v21 }
 0x165   :  { %341 = vmatpush3.msra.mxu1 %v143_v21 }
 0x167   :  { %v141_v22 = vpop.permute.xlu0 %140 }
 0x168   :  { %342 = vmatprep.subr.mxu1 %v141_v22 }
 0x169   :  { %343 = vmatpush3.msra.mxu1 %v141_v22 }
 0x16a   :  { %345 = vmatmul.mubr.msk.f32.vlgmr.msra.gmra.mxu1 %vm146_vm0, %v135_v23 }
 0x22a   :  { %v346_v25 = vpop.f32.mrf.mxu1 }
 0x22b   :  { %v225_v29 = vadd.f32 %v346_v25, %v137_v26 }
 0x22c   :  { %v219_v27 = vpop.f32.mrf.mxu1 }
 0x22d   :  { %v220_v28 = vadd.f32 %v219_v27, %v137_v26 }
 0x22f   :  { %230 = vperm.xlu1 %353, %v220_v28  }
 0x233   :  { %235 = vperm.xlu1 %353, %v225_v29  }
 0x2aa   :  { %v231_v34 = vpop.permute.xlu1 %230 }
 0x2ab   :  { %v238_v39 = vadd.f32 %v231_v34, %v125_v20 }
 0x2ad   :  { %v243_v40 = vmul.f32 %v242_v35, %v238_v39 }
 0x2ae   :  { %v236_v43 = vpop.permute.xlu1 %235 }
 0x2af   :  { %v248_v45 = vsub.f32 %v243_v40, %v246_v38  ;;  %v239_v46 = vadd.f32 %v339_v19, %v236_v43 }
 0x2b1   :  { %v244_v47 = vmul.f32 %v242_v35, %v239_v46  ;;  %v259_v49 = vadd.f32 %v257_v42, %v248_v45 }
 0x2b3   :  { %v249_v50 = vsub.f32 %v244_v47, %v247_v44  ;;  %261 = vst [vmem:[#allocation6] sm:$0xff] %v259_v49 }
 0x2b5   :  { %v260_v51 = vadd.f32 %v258_v48, %v249_v50 }
 0x2b7   :  { %262 = vst [vmem:[#allocation6 + $0x8] sm:$0xff] %v260_v51 }
 0x2b8   :  { %378 = shalt.err (!%p375_p9)
}
 0x2b9   :  { %s395_s25 = smov 128   ;;  %s396_s26 = smov 8  }
 0x2ba   :  { %274 = dma.vmem_to_hbm [thread:$0]  %s269_s24, 256, %s517_s6, [#allocation4], %s395_s25, %s395_s25, %s396_s26  }
 0x2bb   :  { %389 = dma.done.wait [#allocation4], 256  }
 0x2bc   :  { %390 = vsyncadd [#allocation4], 4294967040 }
 0x2bd   :  { %278 = vsyncpa [#allocation4], 1 }
 0x2be   :  { %279 = vsyncpa [#allocation5], 1 }

</bundles_post_ra>
